<compile_context>
chip_gen: v6e
topology: v6e:2x2x1
jax: 0.10.0
libtpu: 0.0.40
codegen_flags: <defaults>
</compile_context>

<pallas_src>
import functools

import jax
import jax.numpy as jnp
import numpy as np
from jax import lax
from jax.experimental import pallas as pl
from jax.experimental.pallas import tpu as pltpu


def _round_up(x, m):
    return (x + m - 1) // m * m


def _vmem_capacity_bytes():
    try:
        return int(pltpu.get_tpu_info().vmem_capacity_bytes)
    except Exception:
        return 64 * 1024 * 1024  # conservative default (v7x physical VMEM)


# --------------------------------------------------------------------------
# Path A: batch-blocked, single spatial tile per grid step.
# --------------------------------------------------------------------------
def _ca_batch_kernel(x_ref, w1t_ref, w2t_ref, o_ref, *, true_hw, hw_pad):
    # x_ref  : (TB, C, hw_pad)  input tile (spatial tail zero-padded)
    # w1t_ref: (C, Cr) f32      fc1 weight, transposed (1x1 conv, no bias)
    # w2t_ref: (Cr, C) f32      fc2 weight, transposed (1x1 conv, no bias)
    # o_ref  : (TB, 1, C)       lane-dense per-channel attention rows
    x = x_ref[...].astype(jnp.float32)                       # (TB, C, hw_pad)
    tb = x.shape[0]

    # avg pool: zero padding is neutral for the sum; divide by the true H*W
    avg = jnp.sum(x, axis=-1) * (1.0 / true_hw)              # (TB, C)

    # max pool: only the final 128-lane chunk can contain padding
    if hw_pad == true_hw:
        mx = jnp.max(x, axis=-1)                             # (TB, C)
    else:
        hw_floor = hw_pad - 128
        tail = x[:, :, hw_floor:]                            # (TB, C, 128)
        lane = lax.broadcasted_iota(jnp.int32, tail.shape, 2)
        tail = jnp.where(lane < (true_hw - hw_floor), tail, -jnp.inf)
        mx = jnp.max(tail, axis=-1)                          # (TB, C)
        if hw_floor > 0:
            mx = jnp.maximum(mx, jnp.max(x[:, :, :hw_floor], axis=-1))

    # fused shared MLP for both pooled branches: one (2*TB, C) matmul chain
    pooled = jnp.concatenate([avg, mx], axis=0)              # (2*TB, C)
    h = jnp.dot(pooled, w1t_ref[...], preferred_element_type=jnp.float32)
    h = jnp.maximum(h, 0.0)                                  # ReLU
    y = jnp.dot(h, w2t_ref[...], preferred_element_type=jnp.float32)  # (2*TB, C)
    out = jax.nn.sigmoid(y[:tb] + y[tb:])                    # (TB, C)
    o_ref[:, 0, :] = out.astype(o_ref.dtype)


# --------------------------------------------------------------------------
# Path B: spatially streamed with lane-wide (C, 128) accumulators.
# --------------------------------------------------------------------------
def _ca_stream_kernel(x_ref, w1t_ref, w2t_ref, o_ref, sum_sc, max_sc,
                      *, true_hw, block_hw, ragged):
    # x_ref  : (1, C, block_hw)  streamed tile for (batch b, spatial tile s)
    # sum_sc : (C, 128) f32      lane-wide running partial sums
    # max_sc : (C, 128) f32      lane-wide running partial maxes
    # o_ref  : (1, 1, C)         lane-dense per-channel attention row
    s = pl.program_id(1)
    n_s = pl.num_programs(1)
    nk = block_hw // 128

    @pl.when(s == 0)
    def _():
        sum_sc[...] = jnp.zeros_like(sum_sc)
        max_sc[...] = jnp.full_like(max_sc, -jnp.inf)

    def accumulate(mask_tail):
        # Pure VPU add/max per 128-lane chunk; no cross-lane reduce, no masks
        # on the hot path (zero padding is neutral for the sum).
        @pl.loop(0, nk)
        def _(k):
            off = pl.multiple_of(k * 128, 128)
            chunk = x_ref[0, :, pl.ds(off, 128)].astype(jnp.float32)  # (C, 128)
            sum_sc[...] = sum_sc[...] + chunk
            if mask_tail:
                lane = lax.broadcasted_iota(jnp.int32, chunk.shape, 1)
                gpos = lane + (s * block_hw + off)
                chunk = jnp.where(gpos < true_hw, chunk, -jnp.inf)
            max_sc[...] = jnp.maximum(max_sc[...], chunk)

    if ragged:
        @pl.when(s != n_s - 1)
        def _():
            accumulate(mask_tail=False)        # hot path: no masks

        @pl.when(s == n_s - 1)
        def _():
            accumulate(mask_tail=True)         # ragged tail: mask max only
    else:
        accumulate(mask_tail=False)

    # Once per batch row: single cross-lane reduce + fused 2-row MLP + sigmoid.
    @pl.when(s == n_s - 1)
    def _():
        avg_col = jnp.sum(sum_sc[...], axis=-1, keepdims=True) * (1.0 / true_hw)
        max_col = jnp.max(max_sc[...], axis=-1, keepdims=True)        # (C, 1)
        pooled = jnp.concatenate([avg_col, max_col], axis=1)          # (C, 2)
        dn = (((0,), (0,)), ((), ()))      # contract over channels (LHS dim 0)
        h = lax.dot_general(pooled, w1t_ref[...], dn,
                            preferred_element_type=jnp.float32)       # (2, Cr)
        h = jnp.maximum(h, 0.0)                                       # ReLU
        y = jnp.dot(h, w2t_ref[...], preferred_element_type=jnp.float32)  # (2, C)
        out = jax.nn.sigmoid(y[0:1] + y[1:2])                         # (1, C)
        o_ref[0] = out.astype(o_ref.dtype)


# --------------------------------------------------------------------------
# Wrapper
# --------------------------------------------------------------------------
def channel_attention(x, w1, w2, *, block_hw=None):
    """CBAM channel attention.

    x : (B, C, H, W); w1 : (C//r, C) fc1 weight; w2 : (C, C//r) fc2 weight.
    Returns the (B, C, 1, 1) sigmoid attention map (PyTorch module output).
    """
    B, C, H, W = x.shape
    Cr = w1.shape[0]
    HW = H * W
    itemsize = jnp.dtype(x.dtype).itemsize

    # Generation-aware budgets: ~8 MiB streamed buffers on 128 MiB VMEM parts
    # (v5e/v6e), ~4 MiB on 64 MiB parts (v7x).
    vmem_cap = _vmem_capacity_bytes()
    tile_target = int(min(8 << 20, max(1 << 20, vmem_cap // 16)))

    sublane = max(1, 32 // (8 * itemsize)) * 8      # 8 f32 / 16 bf16 / 32 int8
    c_rows = _round_up(C, sublane)
    hw_pad = _round_up(HW, 128)

    w_bytes = 2 * 4 * (_round_up(C, 8) * _round_up(Cr, 128)
                       + _round_up(Cr, 8) * _round_up(C, 128))

    # Transpose + single f32 cast in the wrapper; no in-kernel weight cast.
    w1t = w1.T.astype(jnp.float32)                  # (C, Cr)
    w2t = w2.T.astype(jnp.float32)                  # (Cr, C)

    if block_hw is None:
        max_lanes = max(128, (tile_target // (c_rows * itemsize)) // 128 * 128)
    else:
        max_lanes = _round_up(block_hw, 128)

    x3 = x.reshape(B, C, HW)

    if hw_pad <= max_lanes:
        # ---------------- Path A: batch-blocked, single spatial tile --------
        if hw_pad != HW:
            x3 = jnp.pad(x3, ((0, 0), (0, 0), (0, hw_pad - HW)))

        # Largest TB (<= 8) that divides B, fits the tile budget, and keeps at
        # least two grid steps when B > 1 (megacore-friendly on v7x).
        tb_fit = max(1, tile_target // max(1, c_rows * hw_pad * itemsize))
        tb_cap = min(8, tb_fit, (max(1, B // 2) if B > 1 else 1))
        TB = 1
        for t in range(tb_cap, 0, -1):
            if B % t == 0:
                TB = t
                break

        est = (2 * TB * c_rows * hw_pad * itemsize       # double-buffered input
               + 2 * TB * _round_up(C, 8) * hw_pad * 4   # f32 temporaries
               + w_bytes + (2 << 20))
        vmem_limit = int(min(0.75 * vmem_cap, max(16 << 20, 2 * est)))

        kernel = functools.partial(_ca_batch_kernel, true_hw=HW, hw_pad=hw_pad)
        out = pl.pallas_call(
            kernel,
            out_shape=jax.ShapeDtypeStruct((B, 1, C), x.dtype),
            grid_spec=pltpu.PrefetchScalarGridSpec(
                num_scalar_prefetch=0,
                grid=(B // TB,),
                in_specs=[
                    pl.BlockSpec((TB, C, hw_pad), lambda i: (i, 0, 0)),
                    pl.BlockSpec((C, Cr), lambda i: (0, 0)),
                    pl.BlockSpec((Cr, C), lambda i: (0, 0)),
                ],
                out_specs=pl.BlockSpec((TB, 1, C), lambda i: (i, 0, 0)),
            ),
            compiler_params=pltpu.CompilerParams(
                dimension_semantics=("parallel",),
                vmem_limit_bytes=vmem_limit,
            ),
        )(x3, w1t, w2t)
        return out.reshape(B, C, 1, 1)

    # -------------------- Path B: spatially streamed -------------------------
    blk = max_lanes
    hw_pad = _round_up(HW, blk)
    n_s = hw_pad // blk
    ragged = hw_pad != HW
    if ragged:
        x3 = jnp.pad(x3, ((0, 0), (0, 0), (0, hw_pad - HW)))

    est = (2 * c_rows * blk * itemsize                    # double-buffered input
           + w_bytes
           + 2 * _round_up(C, 8) * 128 * 4                # (C,128) f32 scratch x2
           + (2 << 20))
    vmem_limit = int(min(0.75 * vmem_cap, max(16 << 20, 2 * est)))

    kernel = functools.partial(_ca_stream_kernel, true_hw=HW, block_hw=blk,
                               ragged=ragged)
    out = pl.pallas_call(
        kernel,
        out_shape=jax.ShapeDtypeStruct((B, 1, C), x.dtype),
        grid_spec=pltpu.PrefetchScalarGridSpec(
            num_scalar_prefetch=0,
            grid=(B, n_s),
            in_specs=[
                pl.BlockSpec((1, C, blk), lambda b, s: (b, 0, s)),
                pl.BlockSpec((C, Cr), lambda b, s: (0, 0)),
                pl.BlockSpec((Cr, C), lambda b, s: (0, 0)),
            ],
            out_specs=pl.BlockSpec((1, 1, C), lambda b, s: (b, 0, 0)),
            scratch_shapes=[
                pltpu.VMEM((C, 128), jnp.float32),   # lane-wide running sum
                pltpu.VMEM((C, 128), jnp.float32),   # lane-wide running max
            ],
        ),
        compiler_params=pltpu.CompilerParams(
            dimension_semantics=("parallel", "arbitrary"),
            vmem_limit_bytes=vmem_limit,
        ),
    )(x3, w1t, w2t)
    return out.reshape(B, C, 1, 1)


def _reference(x, w1, w2):
    # pure-JAX reference matching the PyTorch forward
    avg = jnp.mean(x, axis=(2, 3))                       # (B, C)
    mx = jnp.max(x, axis=(2, 3))                         # (B, C)

    def branch(p):
        h = jnp.maximum(p @ w1.T, 0.0)                   # (B, Cr)
        return h @ w2.T                                  # (B, C)

    return jax.nn.sigmoid(branch(avg) + branch(mx))[:, :, None, None]


if __name__ == "__main__":
    B, C, H, W = 2, 32, 16, 16
    ratio = 4
    Cr = C // ratio

    key = jax.random.PRNGKey(0)
    kx, k1, k2 = jax.random.split(key, 3)

    x = jax.random.normal(kx, (B, C, H, W), dtype=jnp.float32)
    # deterministic "kaiming-ish" init for the two 1x1 convs (no bias)
    w1 = jax.random.normal(k1, (Cr, C), dtype=jnp.float32) * (1.0 / np.sqrt(C))
    w2 = jax.random.normal(k2, (C, Cr), dtype=jnp.float32) * (1.0 / np.sqrt(Cr))

    # Path A: batch-blocked single-tile (default sizing)
    out = jax.block_until_ready(channel_attention(x, w1, w2))
    np.testing.assert_allclose(np.asarray(out), np.asarray(_reference(x, w1, w2)),
                               rtol=1e-5, atol=1e-5)
    assert out.shape == (B, C, 1, 1)

    # Path B: spatially streamed, non-ragged (HW = 256 -> two 128-lane tiles)
    out_b = jax.block_until_ready(channel_attention(x, w1, w2, block_hw=128))
    np.testing.assert_allclose(np.asarray(out_b), np.asarray(_reference(x, w1, w2)),
                               rtol=1e-5, atol=1e-5)

    # Path B: spatially streamed, ragged tail (HW = 225 -> 128 + masked 97 lanes)
    x2 = jax.random.normal(kx, (B, C, 15, 15), dtype=jnp.float32)
    out_c = jax.block_until_ready(channel_attention(x2, w1, w2, block_hw=128))
    np.testing.assert_allclose(np.asarray(out_c), np.asarray(_reference(x2, w1, w2)),
                               rtol=1e-5, atol=1e-5)

    # Path A: ragged spatial tail with batch blocking (B = 3 -> TB = 1, grid = 3)
    x3 = jax.random.normal(k1, (3, C, 15, 15), dtype=jnp.float32)
    out_d = jax.block_until_ready(channel_attention(x3, w1, w2))
    np.testing.assert_allclose(np.asarray(out_d), np.asarray(_reference(x3, w1, w2)),
                               rtol=1e-5, atol=1e-5)

    print("KERNEL_OK")
</pallas_src>

<mosaic_0001>
module attributes {stable_mosaic.version = 11 : i64} {
  func.func @_ca_batch_kernel(%arg0: i32, %arg1: memref<1x32x256xf32, #tpu.memory_space<vmem>>, %arg2: memref<32x8xf32, #tpu.memory_space<vmem>>, %arg3: memref<8x32xf32, #tpu.memory_space<vmem>>, %arg4: memref<1x1x32xf32, #tpu.memory_space<vmem>>) attributes {dimension_semantics = [#tpu.dimension_semantics<parallel>], iteration_bounds = array<i64: 2>, scalar_prefetch = 0 : i64, scratch_operands = 0 : i64, tpu.core_type = #tpu.core_type<tc>, window_params = [{transform_indices = @transform_0, window_bounds = array<i64: 1, 32, 256>}, {pipeline_mode = #tpu.pipeline_mode<synchronous>, transform_indices = @transform_1, window_bounds = array<i64: 32, 8>}, {pipeline_mode = #tpu.pipeline_mode<synchronous>, transform_indices = @transform_2, window_bounds = array<i64: 8, 32>}, {transform_indices = @transform_3, window_bounds = array<i64: 1, 1, 32>}]} {
    %c0 = arith.constant 0 : index
    %c0_0 = arith.constant 0 : index
    %c0_1 = arith.constant 0 : index
    %0 = vector.load %arg1[%c0, %c0_0, %c0_1] : memref<1x32x256xf32, #tpu.memory_space<vmem>>, vector<1x32x256xf32>
    %cst = arith.constant dense<0.000000e+00> : vector<1x32xf32>
    %1 = vector.multi_reduction <add>, %0, %cst [2] : vector<1x32x256xf32> to vector<1x32xf32>
    %cst_2 = arith.constant 3.906250e-03 : f32
    %2 = vector.broadcast %cst_2 : f32 to vector<1x32xf32>
    %3 = arith.mulf %1, %2 : vector<1x32xf32>
    %cst_3 = arith.constant dense<0xFF800000> : vector<1x32xf32>
    %4 = vector.multi_reduction <maximumf>, %0, %cst_3 [2] : vector<1x32x256xf32> to vector<1x32xf32>
    %5 = tpu.concatenate %3, %4 in 0 : vector<1x32xf32>, vector<1x32xf32> -> vector<2x32xf32>
    %c0_4 = arith.constant 0 : index
    %c0_5 = arith.constant 0 : index
    %6 = vector.load %arg2[%c0_4, %c0_5] : memref<32x8xf32, #tpu.memory_space<vmem>>, vector<32x8xf32>
    %cst_6 = arith.constant dense<0.000000e+00> : vector<2x8xf32>
    %7 = tpu.matmul %5, %6, %cst_6 {dimension_numbers = #tpu.dot_dimension_numbers<[1], [0], [0], [1], [0, 0, 1, 1], [], []>} : vector<2x32xf32>, vector<32x8xf32>, vector<2x8xf32> -> vector<2x8xf32>
    %cst_7 = arith.constant 0.000000e+00 : f32
    %8 = vector.broadcast %cst_7 : f32 to vector<2x8xf32>
    %9 = arith.maximumf %7, %8 : vector<2x8xf32>
    %c0_8 = arith.constant 0 : index
    %c0_9 = arith.constant 0 : index
    %10 = vector.load %arg3[%c0_8, %c0_9] : memref<8x32xf32, #tpu.memory_space<vmem>>, vector<8x32xf32>
    %cst_10 = arith.constant dense<0.000000e+00> : vector<2x32xf32>
    %11 = tpu.matmul %9, %10, %cst_10 {dimension_numbers = #tpu.dot_dimension_numbers<[1], [0], [0], [1], [0, 0, 1, 1], [], []>} : vector<2x8xf32>, vector<8x32xf32>, vector<2x32xf32> -> vector<2x32xf32>
    %12 = vector.extract_strided_slice %11 {offsets = [0, 0], sizes = [1, 32], strides = [1, 1]} : vector<2x32xf32> to vector<1x32xf32>
    %13 = vector.extract_strided_slice %11 {offsets = [1, 0], sizes = [1, 32], strides = [1, 1]} : vector<2x32xf32> to vector<1x32xf32>
    %14 = arith.addf %12, %13 : vector<1x32xf32>
    %15 = arith.negf %14 : vector<1x32xf32>
    %16 = math.exp %15 : vector<1x32xf32>
    %cst_11 = arith.constant 1.000000e+00 : f32
    %17 = vector.broadcast %cst_11 : f32 to vector<1x32xf32>
    %18 = arith.addf %17, %16 : vector<1x32xf32>
    %19 = arith.divf %17, %18 : vector<1x32xf32>
    %c0_12 = arith.constant 0 : index
    %c0_13 = arith.constant 0 : index
    %c0_14 = arith.constant 0 : index
    %20 = vector.load %arg4[%c0_12, %c0_13, %c0_14] : memref<1x1x32xf32, #tpu.memory_space<vmem>>, vector<1x1x32xf32>
    %21 = vector.shape_cast %20 : vector<1x1x32xf32> to vector<1x32xf32>
    %22 = vector.shape_cast %19 : vector<1x32xf32> to vector<1x1x32xf32>
    tpu.vector_store %arg4[%c0_12, %c0_13, %c0_14], %22 {strides = array<i32>} : memref<1x1x32xf32, #tpu.memory_space<vmem>>, vector<1x1x32xf32>,
    return
  }
  func.func @transform_0(%arg0: i32) -> (i32, i32, i32) {
    %c0_i32 = arith.constant 0 : i32
    %c0_i32_0 = arith.constant 0 : i32
    %c0_i32_1 = arith.constant 0 : i32
    return %arg0, %c0_i32, %c0_i32_0 : i32, i32, i32
  }
  func.func @transform_1(%arg0: i32) -> (i32, i32) {
    %c0_i32 = arith.constant 0 : i32
    %c0_i32_0 = arith.constant 0 : i32
    %c0_i32_1 = arith.constant 0 : i32
    return %c0_i32, %c0_i32_0 : i32, i32
  }
  func.func @transform_2(%arg0: i32) -> (i32, i32) {
    %c0_i32 = arith.constant 0 : i32
    %c0_i32_0 = arith.constant 0 : i32
    %c0_i32_1 = arith.constant 0 : i32
    return %c0_i32, %c0_i32_0 : i32, i32
  }
  func.func @transform_3(%arg0: i32) -> (i32, i32, i32) {
    %c0_i32 = arith.constant 0 : i32
    %c0_i32_0 = arith.constant 0 : i32
    %c0_i32_1 = arith.constant 0 : i32
    return %arg0, %c0_i32, %c0_i32_0 : i32, i32, i32
  }
}

</mosaic_0001>

<bundles_post_ra>
// kernel: tpu_custom_call.1
= control target key start
LH: loop header
LB: loop body
LE: loop exit
PB: predicated region body
PF: predicated region fallthrough
CT: control target
= control target key end

     0   :  { %8 = vsyncpa [#allocation3], 0  ;;  %s903_s0 = inlined_call_operand.hbm [shape: f32[2,32,256], index: 0, kind: input, shape index: {}]   ;;  %s904_s1 = inlined_call_operand.vmem [shape: f32[32,8], index: 1, kind: input, shape index: {}]   ;;  %s905_s2 = inlined_call_operand.vmem [shape: f32[8,32], index: 2, kind: input, shape index: {}]   ;;  %s906_s3 = inlined_call_operand.hbm [shape: f32[2,1,32], index: 3, kind: output, shape index: {}]  }
   0x1   :  { %10 = vsyncpa [#allocation3 + $0x1], 0 }
   0x2   :  { %11 = vsyncpa [#allocation4], 0 }
   0x3   :  { %13 = vsyncpa [#allocation4 + $0x1], 0  ;;  %s739_s12 = smov 0   ;;  %s741_s13 = smov 0  }
   0x4   :  { %s743_s14 = smov 0   ;;  %s745_s15 = smov 0  }
   0x5 LB: > { %s760_s16 = sadd.s32 4294967295, %s711_s15   ;;  %s527_s17 = sadd.s32 4294967294, %s711_s15   ;;  %s711_s15 = sphi %s745_s15, %s921_s15   ;;  %s707_s14 = sphi %s743_s14, %s920_s14   ;;  %s703_s13 = sphi %s741_s13, %s919_s13   ;;  %s699_s12 = sphi %s739_s12, %s918_s12  }
   0x6   : > { %s764_s18 = sadd.s32 1, %s711_s15   ;;  %s26_s19 = sadd.s32 1, %s707_s14 }
   0x7   : > { %s23_s20 = ssub.s32 %s711_s15, %s764_s18  ;;  %p33_p0 = scmp.ne.s32.totalorder %s707_s14, %s703_s13 }
   0x8   : > { %p24_p1 = scmp.eq.s32.totalorder %s23_s20, 0  ;;  %p34_p2 = scmp.eq.s32.totalorder %s711_s15, 0 }
   0x9   : > { %p39_p3 = scmp.ne.s32.totalorder %s703_s13, %s699_s12  ;;  %p40_p4 = scmp.eq.s32.totalorder %s760_s16, 0 }
   0xa   : > { %s776_s21 = scalar_select %p24_p1, %s707_s14, %s26_s19  }
   0xb   : > { %p778_p5 = por %p34_p2, %p33_p0  ;;  %p782_p6 = por %p40_p4, %p39_p3 }
   0xc   : > { %p105_p7 = scmp.eq.s32.totalorder %s760_s16, 1  ;;  %p111_p8 = scmp.eq.s32.totalorder %s527_s17, 1 }
   0xd   : > { %s910_s23 = scalar_select %p782_p6, 1, 0 }
   0xe   : > { %p577_p10 = scmp.lt.s32.totalorder %s711_s15, 2  ;;  %p789_p11 = por %p105_p7, %p33_p0 }
   0xf   : > { %p793_p12 = por %p111_p8, %p39_p3  ;;  %s137_s26 = sand.u32 1, %s707_s14  }
  0x10   : > { %s911_s24 = scalar_select %p789_p11, 1, 0 }
  0x11   : > { %s912_s25 = scalar_select %p793_p12, 1, 0 }
  0x12   : > { %s541_s27 = sshll.u32 %s711_s15, 10  ;;  %s530_s28 = sshll.u32 %s137_s26, 6 }
  0x13   : > { %s802_s4 = scalar_lea.hbm %s903_s0, %s541_s27  ;;  %s141_s5 = scalar_lea.vmem [#allocation2], %s530_s28 }
  0x14   : > { %s148_s6 = sshll.u32 %s141_s5, 4  ;;  %p806_p13 = pnand %p577_p10, %p778_p5  ;;  %s810_s6 = int_to_ptr.vmem [resolvable:$true] %s148_s6 }
  0x15   : > { %s812_s8 = scalar_lea.sflag [#allocation3], %s137_s26  ;;  %s619_s9 = scalar_lea.hbm %s802_s4, 1024 }
  0x16   : > { %p620_p0 = scmp.ne.s32.totalorder %s802_s4, %s619_s9  ;;  %p621_p1 = pneg %p806_p13 }
  0x17   : > { %s624_s17 = scalar_lea.hbm %s903_s0, 2048  ;;  %p625_p4 = scmp.lt.s32.totalorder %s802_s4, %s903_s0 }
  0x18   : > { %p622_p2 = pnand %p621_p1, %p620_p0  ;;  %p626_p5 = scmp.lt.s32.totalorder %s624_s17, %s619_s9 }
  0x1a   : > { %p623_p3 = pneg %p622_p2  ;;  %p627_p7 = por %p626_p5, %p625_p4 }
  0x1c   : > { %p628_p8 = pnand %p627_p7, %p623_p3 }
  0x1e   : > { %631 = shalt.err (!%p628_p8)
}
  0x1f   : > { %s632_s22 = scalar_lea.vmem %s810_s6, 1024  ;;  %s713_s26 = smov [#allocation2]  }
  0x20   : > { %p633_p10 = scmp.ne.s32.totalorder %s810_s6, %s632_s22  ;;  %s637_s27 = sshll.u32 %s713_s26, 4  ;;  %s638_s27 = int_to_ptr.vmem [resolvable:$false] %s637_s27 }
  0x21   : > { %s639_s28 = scalar_lea.vmem %s638_s27, 2048  ;;  %p640_p2 = scmp.lt.s32.totalorder %s810_s6, %s638_s27 }
  0x22   : > { %p635_p9 = pnand %p633_p10, %p621_p1  ;;  %p641_p12 = scmp.lt.s32.totalorder %s639_s28, %s632_s22 }
  0x24   : > { %p636_p0 = pneg %p635_p9  ;;  %p642_p11 = por %p641_p12, %p640_p2 }
  0x26   : > { %p643_p6 = pnand %p642_p11, %p636_p0 }
  0x28   : > { %646 = shalt.err (!%p643_p6)
}
  0x29   : > { %s714_s29 = smov 256   ;;  %s715_s30 = smov 16  }
  0x2a   : > { %572 = dma.hbm_to_vmem [thread:$0]  (!%p806_p13), %s802_s4, 1024, %s810_s6, %s812_s8, %s714_s29, %s714_s29, %s715_s30  }
  0x2b   : > { %p533_p9 = scmp.ge.s32.totalorder %s711_s15, 1  ;;  %p156_p1 = scmp.lt.s32.totalorder %s711_s15, 3 }
  0x2d   : > { %p157_p3 = pnand %p533_p9, %p156_p1 }
  0x2e   : > { %s836_s5 = sand.u32 (!%p157_p3), 1, %s703_s13   ;;  %p914_p6 = scmp.ne.s32.totalorder (!%p157_p3), %s910_s23, 0 }
  0x2f   : > { %160 = sbr.rel (%p157_p3) target bundleno = 649 (0x289), region = 32  ;;  %s534_s9 = sshll.u32 (!%p157_p3), %s836_s5, 6 }
  0x30   : > { %s163_s10 = scalar_lea.sflag (!%p157_p3), [#allocation3], %s836_s5  ;;  %s166_s11 = scalar_lea.vmem (!%p157_p3), [#allocation2], %s534_s9 }
  0x34   : > { %690 = dma.done.wait (%p914_p6), %s163_s10, 1024  }
  0x35   : > { %692 = vsyncadd (%p914_p6), %s163_s10, 4294966272  ;;  %v192_v0 = vld [vmem:[%s166_s11 + $0x20] sm:$0xff]  ;;  %v193_v1 = vld [vmem:[%s166_s11 + $0x28] sm:$0xff]  ;;  %v716_v16 = vmov 0.0   ;;  %vm717_vm0 = vmmov 0   ;;  %v228_v21 = vlaneseq  ;;  %vm239_vm1 = vcmask 130112  }
  0x36   : > { %v188_v2 = vld [vmem:[%s166_s11] sm:$0xff]  ;;  %v202_v3 = vadd.f32 %v193_v1, %v192_v0  ;;  %v189_v4 = vld [vmem:[%s166_s11 + $0x8] sm:$0xff]  ;;  %v194_v5 = vld [vmem:[%s166_s11 + $0x30] sm:$0xff]  ;;  %v218_v15 = vmax.f32 %v192_v0, %v193_v1  ;;  %549 = vmatprep.subr.mxu0 %v716_v16  ;;  %560 = vmatprep.subr.mxu1 %v716_v16  ;;  %vm246_vm2 = vcmask 195712   ;;  %vm253_vm3 = vcmask 261312   ;;  %s538_s27 = sshll.u32 %s760_s16, 4 }
  0x37   : > { %v195_v6 = vld [vmem:[%s166_s11 + $0x38] sm:$0xff]  ;;  %v196_v7 = vadd.f32 %v189_v4, %v188_v2  ;;  %v190_v8 = vld [vmem:[%s166_s11 + $0x10] sm:$0xff]  ;;  %v212_v13 = vmax.f32 %v188_v2, %v189_v4  ;;  %v283_v19 = vld [vmem:[%s904_s1 + $0x8] sm:$0xff]  ;;  %557 = vmatprep.mubr.msk.f32.mxu0 %vm717_vm0, %v716_v16  ;;  %562 = vmatprep.mubr.msk.f32.mxu1 %vm717_vm0, %v716_v16  ;;  %v229_v22 = vand.u32 127, %v228_v21  ;;  %v231_v25 = vshrl.u32 %v228_v21, 7  ;;  %s187_s28 = scalar_lea.vmem [#allocation5], %s836_s5  ;;  %s866_s10 = scalar_lea.hbm %s906_s3, %s538_s27 }
  0x38   : > { %v191_v9 = vld [vmem:[%s166_s11 + $0x18] sm:$0xff]  ;;  %203 = vadd.xlane.f32.xlu1 %v202_v3  ;;  %v205_v10 = vadd.f32 %v195_v6, %v194_v5  ;;  %v221_v14 = vmax.f32 %v194_v5, %v195_v6  ;;  %v284_v18 = vld [vmem:[%s904_s1 + $0x10] sm:$0xff]  ;;  %v282_v20 = vld [vmem:[%s904_s1] sm:$0xff]  ;;  %vm280_vm4 = vcmask 1040384   ;;  %vm286_vm5 = vcmask 261120   ;;  %s461_s29 = sshll.u32 %s187_s28, 4  ;;  %s462_s29 = int_to_ptr.vmem [resolvable:$true] %s461_s29 }
  0x39   : > { %197 = vadd.xlane.f32.xlu0 %v196_v7  ;;  %v199_v11 = vadd.f32 %v191_v9, %v190_v8  ;;  %v215_v12 = vmax.f32 %v190_v8, %v191_v9  ;;  %v285_v17 = vld [vmem:[%s904_s1 + $0x18] sm:$0xff]  ;;  %v234_v24 = vadd.s32 4294967288, %v229_v22  ;;  %v241_v27 = vadd.s32 4294967280, %v229_v22  ;;  %v361_v58 = vld [vmem:[%s905_s2] sm:$0xff]  ;;  %s449_s11 = scalar_lea.sflag [#allocation4], %s836_s5  ;;  %s647_s23 = scalar_lea.vmem %s462_s29, 16 }
  0x3a   : > { %550 = vmatpush3.msra.mxu0 %v285_v17  ;;  %v232_v30 = vsub.s32 %v229_v22, %v231_v25  ;;  %v248_v32 = vadd.s32 4294967272, %v229_v22  ;;  %561 = vmatpush3.msra.mxu1 %v361_v58  ;;  %vm362_vm6 = vcmask 64512   ;;  %vm446_vm7 = vcmask 253952   ;;  %p648_p11 = scmp.ne.s32.totalorder %s462_s29, %s647_s23  ;;  %p915_p12 = scmp.ne.s32.totalorder %s911_s24, 0 }
  0x3b   : > { %551 = vmatprep.subr.mxu0 %v716_v16  ;;  %v237_v29 = vsub.s32 %v234_v24, %v231_v25  ;;  %v244_v35 = vsub.s32 %v241_v27, %v231_v25  ;;  %s718_s4 = smov [#allocation5]  }
  0x3c   : > { %206 = vadd.xlane.f32.xlu1 %v205_v10  ;;  %552 = vmatpush3.msra.mxu0 %v284_v18  ;;  %v251_v40 = vsub.s32 %v248_v32, %v231_v25  ;;  %p649_p13 = pnand %p648_p11, %p915_p12  ;;  %s651_s6 = sshll.u32 %s718_s4, 4  ;;  %s652_s6 = int_to_ptr.vmem [resolvable:$false] %s651_s6 }
  0x3d   : > { %200 = vadd.xlane.f32.xlu0 %v199_v11  ;;  %553 = vmatprep.subr.mxu0 %v716_v16  ;;  %s653_s16 = scalar_lea.vmem %s652_s6, 32  ;;  %p654_p5 = scmp.lt.s32.totalorder %s462_s29, %s652_s6 }
  0x3e   : > { %554 = vmatpush3.msra.mxu0 %v283_v19  ;;  %p650_p4 = pneg %p649_p13  ;;  %p655_p7 = scmp.lt.s32.totalorder %s653_s16, %s647_s23 }
  0x3f   : > { %555 = vmatprep.subr.mxu0 %v716_v16 }
  0x40   : > { %216 = vmax.xlane.f32.xlu1 %v215_v12  ;;  %556 = vmatpush3.msra.mxu0 %v282_v20  ;;  %p656_p8 = por %p655_p7, %p654_p5 }
  0x41   : > { %213 = vmax.xlane.f32.xlu0 %v212_v13 }
  0x42   : > { %p657_p10 = pnand %p656_p8, %p650_p4 }
  0x44   : > { %222 = vmax.xlane.f32.xlu1 %v221_v14 }
  0x45   : > { %219 = vmax.xlane.f32.xlu0 %v218_v15 }
  0xc1   : > { %v204_v23 = vpop.xlane.xlu1 %203 }
  0xc2   : > { %v198_v26 = vpop.xlane.xlu0 %197  ;;  %v210_v36 = vmul.f32 0.00390625, %v204_v23 }
  0xc3   : > { %v208_v31 = vmul.f32 0.00390625, %v198_v26 }
  0xc4   : > { %v245_v46 = vrot.slane %v210_v36, %v244_v35 }
  0xc5   : > { %v207_v28 = vpop.xlane.xlu1 %206  ;;  %v233_v39 = vrot.slane %v208_v31, %v232_v30 }
  0xc6   : > { %v201_v33 = vpop.xlane.xlu0 %200  ;;  %v211_v41 = vmul.f32 0.00390625, %v207_v28 }
  0xc7   : > { %v209_v34 = vmul.f32 0.00390625, %v201_v33 }
  0xc8   : > { %v252_v48 = vrot.slane %v211_v41, %v251_v40 }
  0xc9   : > { %v238_v37 = vrot.slane %v209_v34, %v237_v29  ;;  %v217_v38 = vpop.xlane.xlu1 %216 }
  0xca   : > { %v214_v42 = vpop.xlane.xlu0 %213  ;;  %v267_v44 = vrot.slane %v217_v38, %v237_v29 }
  0xcb   : > { %v240_v43 = vsel %vm239_vm1, %v238_v37, %v233_v39  ;;  %v263_v45 = vrot.slane %v214_v42, %v232_v30 }
  0xcc   : > { %v247_v52 = vsel %vm246_vm2, %v245_v46, %v240_v43 }
  0xcd   : > { %v223_v47 = vpop.xlane.xlu1 %222  ;;  %v268_v53 = vsel %vm239_vm1, %v267_v44, %v263_v45  ;;  %v254_v56 = vsel %vm253_vm3, %v252_v48, %v247_v52 }
  0xce   : > { %v220_v49 = vpop.xlane.xlu0 %219  ;;  %v277_v50 = vrot.slane %v223_v47, %v251_v40 }
  0xcf   : > { %v272_v51 = vrot.slane %v220_v49, %v244_v35 }
  0xd1   : > { %v273_v54 = vsel %vm246_vm2, %v272_v51, %v268_v53 }
  0xd2   : > { %v278_v55 = vsel %vm253_vm3, %v277_v50, %v273_v54 }
  0xd3   : > { %v281_v57 = vsel %vm280_vm4, %v254_v56, %v278_v55 }
  0xd4   : > { %558 = vmatmul.mubr.msk.f32.vlgmr.msra.gmra.mxu0 %vm286_vm5, %v281_v57 }
 0x194   : > { %v356_v59 = vpop.f32.mrf.mxu0 }
 0x195   : > { %v360_v60 = vmax.f32 %v356_v59, 0.0 }
 0x196   : > { %v559_v61 = vpop.f32.mrf.mxu0 }
 0x197   : > { %563 = vmatmul.mubr.msk.f32.vlgmr.msra.gmra.mxu1 %vm362_vm6, %v360_v60 }
 0x257   : > { %v432_v62 = vpop.f32.mrf.mxu1 }
 0x258   : > { %v437_v63 = vrot.slane %v432_v62, 1 }
 0x259   : > { %v564_v0 = vpop.f32.mrf.mxu1 }
 0x25a   : > { %v439_v1 = vadd.f32 %v437_v63, %v432_v62 }
 0x25c   : > { %v537_v2 = vmul.f32 -1.442695, %v439_v1 }
 0x25e   : > { %615 = vpow2.f32 %v537_v2 }
 0x26b   : > { %v616_v3 = vpop.eup %615 }
 0x26c   : > { %v443_v4 = vadd.f32 1.0, %v616_v3 }
 0x26e   : > { %617 = vrcp.f32 %v443_v4 }
 0x27b   : > { %v618_v5 = vpop.eup %617 }
 0x27c   : > { %447 = vst.msk [vmem:[%s187_s28] sm:$0x1] %vm446_vm7, %v618_v5 }
 0x27d   : > { %660 = shalt.err (!%p657_p10)
}
 0x27e   : > { %s661_s7 = scalar_lea.hbm %s866_s10, 16  ;;  %s665_s17 = scalar_lea.hbm %s906_s3, 32 }
 0x27f   : > { %p662_p0 = scmp.ne.s32.totalorder %s866_s10, %s661_s7  ;;  %p666_p1 = scmp.lt.s32.totalorder %s866_s10, %s906_s3 }
 0x280   : > { %p667_p3 = scmp.lt.s32.totalorder %s665_s17, %s661_s7 }
 0x281   : > { %p663_p2 = pnand %p662_p0, %p915_p12 }
 0x282   : > { %p668_p6 = por %p667_p3, %p666_p1 }
 0x283   : > { %p664_p9 = pneg %p663_p2 }
 0x285   : > { %p669_p11 = pnand %p668_p6, %p664_p9 }
 0x287   : > { %672 = shalt.err (!%p669_p11)
}
 0x288   : > { %567 = dma.vmem_to_hbm [thread:$0]  (%p915_p12), %s462_s29, 16, %s866_s10, %s449_s11  }
 0x289 PF: > { %s473_s22 = sand.u32 1, %s699_s12   ;;  %p916_p13 = scmp.ne.s32.totalorder %s912_s25, 0 }
 0x28a   : > { %p917_p4 = scmp.ge.s32.totalorder %s711_s15, 2  ;;  %s474_s26 = scalar_lea.sflag [#allocation4], %s473_s22 }
 0x28c   : > { %p574_p5 = pnand %p917_p4, %p916_p13 }
 0x28e   : > { %p575_p7 = pneg %p574_p5 }
 0x290   : > { %694 = dma.done.wait (%p575_p7), %s474_s26, 16  }
 0x291   : > { %696 = vsyncadd (%p575_p7), %s474_s26, 4294967280  ;;  %p16_p8 = scmp.ge.s32.totalorder %s764_s18, 4   ;;  %s918_s12 = smov %s703_s13 }
 0x292   : > { %s919_s13 = smov %s707_s14  ;;  %s920_s14 = smov %s776_s21 }
 0x293   : > { %s921_s15 = smov %s764_s18  ;;  %18 = sbr.rel (!%p16_p8) target bundleno = 5 (0x5), region = 77 }
 0x298   :  { %478 = vsyncpa [#allocation3], 1 }
 0x299   :  { %480 = vsyncpa [#allocation3 + $0x1], 1 }
 0x29a   :  { %481 = vsyncpa [#allocation4], 1 }
 0x29b   :  { %483 = vsyncpa [#allocation4 + $0x1], 1 }

</bundles_post_ra>
